<compile_context>
chip_gen: v7x
topology: tpu7x:2x2x1
jax: 0.10.0
libtpu: 0.0.40
codegen_flags: <defaults>
</compile_context>

<pallas_src>
import jax
import jax.numpy as jnp
from jax.experimental import pallas as pl
from jax.experimental.pallas import tpu as pltpu


def _relu(x):
    # afunc -> ReLU
    return jnp.maximum(x, 0.0)


def _make_cn2h_kernel(n_modules, dim_out, act, compute_dtype):
    def kernel(x_ref, w1_ref, b1_ref, w2_ref, b2_ref, clip_ref, o_ref):
        x = x_ref[...]                                           # (tile_b, dim_in), bf16
        # Layer 1: all modules fused into ONE wide MXU matmul (N = M*module_size).
        h = jnp.dot(x, w1_ref[...], preferred_element_type=jnp.float32)
        h = act(h + b1_ref[...])                                 # (tile_b, M*S), f32
        # Layer 2: single matmul against the block-diagonal, cw-prescaled W2.
        y = jnp.dot(h.astype(compute_dtype), w2_ref[...],
                    preferred_element_type=jnp.float32)          # (tile_b, M*dim_out), f32
        y = y + b2_ref[...]                                      # cw-prescaled bias
        bnd = clip_ref[...]                                      # (1, M*dim_out): +bound*cw_m
        y = jnp.clip(y, -bnd, bnd)                               # hardtanh with cw folded in
        # Convex-combination sum over modules: static column-group slices on the VPU.
        acc = y[:, 0:dim_out]
        for m in range(1, n_modules):
            acc = acc + y[:, m * dim_out:(m + 1) * dim_out]
        o_ref[...] = acc.astype(o_ref.dtype)
    return kernel


def _vmem_capacity_bytes():
    try:
        return int(pltpu.get_tpu_info().vmem_capacity_bytes)
    except Exception:
        return 64 * 1024 * 1024          # conservative fallback (v7x per-TC)


def _padded_vmem_bytes(shape, dtype):
    """Layout-padded VMEM footprint: lane dim -> 128, sublane dim -> 8*packing."""
    dt = jnp.dtype(dtype)
    shape = tuple(shape)
    if len(shape) < 2:
        shape = (1,) * (2 - len(shape)) + shape
    *lead, sub, lane = shape
    packing = max(1, 4 // dt.itemsize)
    sub_p = -(-sub // (8 * packing)) * (8 * packing)
    lane_p = -(-lane // 128) * 128
    n = 1
    for d in lead:
        n *= d
    return n * sub_p * lane_p * dt.itemsize


def _choose_tile_b(B, dim_in, itemsize, vmem_capacity):
    """~8 MiB/x-buffer on 128 MiB chips (v5e/v6e), ~4 MiB on 64 MiB v7x."""
    target = (8 << 20) if vmem_capacity >= (100 << 20) else (4 << 20)
    tile = target // max(1, dim_in * itemsize)
    tile = max(8, min(int(tile), 2048))
    tile = (tile // 8) * 8
    if B <= tile:
        return B                         # single full-extent tile, no (8,128) constraint
    return tile


def cn2h_forward(x, params, *, bound, act=_relu, compute_dtype=jnp.bfloat16,
                 core_parallel=False):
    """x: [B, C, H, W] (or [B, dim_in]); params: dict W1, b1, W2, b2, alpha."""
    B = x.shape[0]
    x2d = x.reshape(B, -1)                                       # PyTorch x.view(B, -1)
    dim_in = x2d.shape[1]

    w1, b1 = params["W1"], params["b1"]                          # (M, dim_in, S), (M, 1, S)
    w2, b2 = params["W2"], params["b2"]                          # (M, S, dim_out), (M, 1, dim_out)
    alpha = params["alpha"]                                      # (M, 1, 1)
    n_modules, _, module_size = w1.shape
    dim_out = w2.shape[2]
    bound = float(bound)
    ms_total = n_modules * module_size                           # fused hidden width
    out_total = n_modules * dim_out                              # fused layer-2 width

    # Convex-combination weights (tiny scalar preprocessing, plain JAX). cw_m > 0.
    a = jnp.abs(alpha).astype(jnp.float32)
    cw = (bound / n_modules + a) / (1.0 + jnp.sum(a))            # (M, 1, 1), f32

    # ---- one-time parameter fusion / folding (wrapper side) ----
    # Layer 1: concat modules along the output axis -> single (dim_in, M*S) matrix.
    w1_f = jnp.transpose(w1, (1, 0, 2)).reshape(dim_in, ms_total).astype(compute_dtype)
    b1_f = b1.reshape(1, ms_total).astype(jnp.float32)
    # Layer 2: fold cw into W2/b2, assemble block-diagonal (M*S, M*dim_out).
    w2_s = (w2 * cw).astype(jnp.float32)                         # (M, S, dim_out)
    eye = jnp.eye(n_modules, dtype=jnp.float32)
    w2_bd = jnp.einsum("msd,mn->msnd", w2_s, eye).reshape(ms_total, out_total)
    w2_bd = w2_bd.astype(compute_dtype)
    b2_f = (b2 * cw).reshape(1, out_total).astype(jnp.float32)
    # hardtanh bounds with cw folded in: cw*clip(y,+-bound) == clip(cw*y, +-bound*cw).
    clip_f = (bound * cw * jnp.ones((n_modules, 1, dim_out), jnp.float32)
              ).reshape(1, out_total).astype(jnp.float32)

    xc = x2d.astype(compute_dtype)                               # bandwidth-heavy operand
    itemsize = jnp.dtype(compute_dtype).itemsize

    vmem_cap = _vmem_capacity_bytes()
    tile_b = _choose_tile_b(B, dim_in, itemsize, vmem_cap)
    num_tiles = pl.cdiv(B, tile_b)       # ragged last tile masked by Pallas -> no jnp.pad copy

    # VMEM budget: layout-padded resident weights + double-buffered x/out tiles + headroom.
    resident = (_padded_vmem_bytes((dim_in, ms_total), compute_dtype)
                + _padded_vmem_bytes((1, ms_total), jnp.float32)
                + _padded_vmem_bytes((ms_total, out_total), compute_dtype)
                + 2 * _padded_vmem_bytes((1, out_total), jnp.float32))
    stream = (_padded_vmem_bytes((tile_b, dim_in), compute_dtype)
              + _padded_vmem_bytes((tile_b, dim_out), jnp.float32))
    vmem_limit = 2 * resident + 2 * stream + (4 << 20)
    vmem_limit = int(max(16 << 20, min(vmem_limit, int(0.6 * vmem_cap))))

    flops = 2 * B * (dim_in * ms_total + ms_total * out_total)
    bytes_accessed = int(xc.size * itemsize
                         + w1_f.size * itemsize + w2_bd.size * itemsize
                         + (b1_f.size + b2_f.size + clip_f.size) * 4
                         + B * dim_out * 4)

    # v7x has 2 TensorCores; CORE_PARALLEL shards the batch-tile axis across them.
    sem = (pltpu.CORE_PARALLEL,) if core_parallel else ("parallel",)

    kernel = _make_cn2h_kernel(n_modules, dim_out, act, compute_dtype)

    out = pl.pallas_call(
        kernel,
        out_shape=jax.ShapeDtypeStruct((B, dim_out), jnp.float32),
        grid=(num_tiles,),
        in_specs=[
            pl.BlockSpec((tile_b, dim_in), lambda i: (i, 0)),       # x tile (streams)
            pl.BlockSpec((dim_in, ms_total), lambda i: (0, 0)),     # fused W1 (resident)
            pl.BlockSpec((1, ms_total), lambda i: (0, 0)),          # fused b1 (resident)
            pl.BlockSpec((ms_total, out_total), lambda i: (0, 0)),  # block-diag cw*W2 (resident)
            pl.BlockSpec((1, out_total), lambda i: (0, 0)),         # cw*b2 (resident)
            pl.BlockSpec((1, out_total), lambda i: (0, 0)),         # +-bound*cw clip bounds
        ],
        out_specs=pl.BlockSpec((tile_b, dim_out), lambda i: (i, 0)),
        compiler_params=pltpu.CompilerParams(
            dimension_semantics=sem,
            vmem_limit_bytes=vmem_limit,
        ),
        cost_estimate=pl.CostEstimate(
            flops=int(flops), transcendentals=0, bytes_accessed=bytes_accessed),
    )(xc, w1_f, b1_f, w2_bd, b2_f, clip_f)

    return out


def init_params(key, dim_in, dim_out, n_modules, module_size):
    """Deterministic PyTorch-matching init (uniform(-stdv, stdv), alpha=0.2)."""
    k1, k2, k3, k4 = jax.random.split(key, 4)
    stdv1 = 1.0 / (dim_in ** 0.5)
    stdv2 = 1.0 / (module_size ** 0.5)
    W1 = jax.random.uniform(k1, (n_modules, dim_in, module_size), jnp.float32, -stdv1, stdv1)
    b1 = jax.random.uniform(k2, (n_modules, 1, module_size), jnp.float32, -stdv1, stdv1)
    W2 = jax.random.uniform(k3, (n_modules, module_size, dim_out), jnp.float32, -stdv2, stdv2)
    b2 = jax.random.uniform(k4, (n_modules, 1, dim_out), jnp.float32, -stdv2, stdv2)
    alpha = 0.2 * jnp.ones((n_modules, 1, 1), jnp.float32)
    return dict(W1=W1, b1=b1, W2=W2, b2=b2, alpha=alpha)


if __name__ == "__main__":
    # args: n_modules=4, module_size=32, bound=1.0; afunc = ReLU
    B, C, H, W = 2, 4, 16, 16
    dim_in = C * H * W          # 1024
    dim_out = 8
    n_modules = 4
    module_size = 32
    bound = 1.0

    key = jax.random.PRNGKey(0)
    kx, kp = jax.random.split(key)
    x = jax.random.normal(kx, (B, C, H, W), jnp.float32)
    params = init_params(kp, dim_in, dim_out, n_modules, module_size)

    out = cn2h_forward(x, params, bound=bound)
    out = jax.block_until_ready(out)

    # Plain-JAX reference with matching bf16 operand casts (original clip-then-scale order).
    x2d = x.reshape(B, -1).astype(jnp.bfloat16)
    w1 = params["W1"].astype(jnp.bfloat16)
    w2 = params["W2"].astype(jnp.bfloat16)
    b1 = params["b1"].astype(jnp.float32)
    b2 = params["b2"].astype(jnp.float32)
    a = jnp.abs(params["alpha"])
    cw = (bound / n_modules + a) / (1.0 + jnp.sum(a))
    h = jnp.einsum("bd,mds->mbs", x2d, w1, preferred_element_type=jnp.float32) + b1
    h = jnp.maximum(h, 0.0)
    y = jnp.einsum("mbs,mso->mbo", h.astype(jnp.bfloat16), w2,
                   preferred_element_type=jnp.float32) + b2
    y = jnp.clip(y, -bound, bound)
    ref = (y * cw).sum(axis=0)

    assert out.shape == (B, dim_out)
    err = jnp.max(jnp.abs(out - ref))
    assert jnp.allclose(out, ref, atol=2e-2, rtol=2e-2), f"max abs err = {err}"

    print("KERNEL_OK")
</pallas_src>

<mosaic_0001>
module attributes {stable_mosaic.version = 11 : i64} {
  func.func @kernel(%arg0: i32, %arg1: memref<2x1024xbf16, #tpu.memory_space<vmem>>, %arg2: memref<1024x128xbf16, #tpu.memory_space<vmem>>, %arg3: memref<1x128xf32, #tpu.memory_space<vmem>>, %arg4: memref<128x32xbf16, #tpu.memory_space<vmem>>, %arg5: memref<1x32xf32, #tpu.memory_space<vmem>>, %arg6: memref<1x32xf32, #tpu.memory_space<vmem>>, %arg7: memref<2x8xf32, #tpu.memory_space<vmem>>) attributes {dimension_semantics = [#tpu.dimension_semantics<parallel>], iteration_bounds = array<i64: 1>, scalar_prefetch = 0 : i64, scratch_operands = 0 : i64, tpu.core_type = #tpu.core_type<tc>, window_params = [{transform_indices = @transform_0, window_bounds = array<i64: 2, 1024>}, {pipeline_mode = #tpu.pipeline_mode<synchronous>, transform_indices = @transform_1, window_bounds = array<i64: 1024, 128>}, {pipeline_mode = #tpu.pipeline_mode<synchronous>, transform_indices = @transform_2, window_bounds = array<i64: 1, 128>}, {pipeline_mode = #tpu.pipeline_mode<synchronous>, transform_indices = @transform_3, window_bounds = array<i64: 128, 32>}, {pipeline_mode = #tpu.pipeline_mode<synchronous>, transform_indices = @transform_4, window_bounds = array<i64: 1, 32>}, {pipeline_mode = #tpu.pipeline_mode<synchronous>, transform_indices = @transform_5, window_bounds = array<i64: 1, 32>}, {transform_indices = @transform_6, window_bounds = array<i64: 2, 8>}]} {
    %c0 = arith.constant 0 : index
    %c0_0 = arith.constant 0 : index
    %0 = vector.load %arg1[%c0, %c0_0] : memref<2x1024xbf16, #tpu.memory_space<vmem>>, vector<2x1024xbf16>
    %c0_1 = arith.constant 0 : index
    %c0_2 = arith.constant 0 : index
    %1 = vector.load %arg2[%c0_1, %c0_2] : memref<1024x128xbf16, #tpu.memory_space<vmem>>, vector<1024x128xbf16>
    %cst = arith.constant dense<0.000000e+00> : vector<2x128xf32>
    %2 = tpu.matmul %0, %1, %cst {dimension_numbers = #tpu.dot_dimension_numbers<[1], [0], [0], [1], [0, 0, 1, 1], [], []>} : vector<2x1024xbf16>, vector<1024x128xbf16>, vector<2x128xf32> -> vector<2x128xf32>
    %c0_3 = arith.constant 0 : index
    %c0_4 = arith.constant 0 : index
    %3 = vector.load %arg3[%c0_3, %c0_4] : memref<1x128xf32, #tpu.memory_space<vmem>>, vector<1x128xf32>
    %4 = vector.broadcast %3 : vector<1x128xf32> to vector<2x128xf32>
    %5 = arith.addf %2, %4 : vector<2x128xf32>
    %cst_5 = arith.constant 0.000000e+00 : f32
    %6 = vector.broadcast %cst_5 : f32 to vector<2x128xf32>
    %7 = arith.maximumf %5, %6 : vector<2x128xf32>
    %8 = arith.truncf %7 : vector<2x128xf32> to vector<2x128xbf16>
    %c0_6 = arith.constant 0 : index
    %c0_7 = arith.constant 0 : index
    %9 = vector.load %arg4[%c0_6, %c0_7] : memref<128x32xbf16, #tpu.memory_space<vmem>>, vector<128x32xbf16>
    %cst_8 = arith.constant dense<0.000000e+00> : vector<2x32xf32>
    %10 = tpu.matmul %8, %9, %cst_8 {dimension_numbers = #tpu.dot_dimension_numbers<[1], [0], [0], [1], [0, 0, 1, 1], [], []>} : vector<2x128xbf16>, vector<128x32xbf16>, vector<2x32xf32> -> vector<2x32xf32>
    %c0_9 = arith.constant 0 : index
    %c0_10 = arith.constant 0 : index
    %11 = vector.load %arg5[%c0_9, %c0_10] : memref<1x32xf32, #tpu.memory_space<vmem>>, vector<1x32xf32>
    %12 = vector.broadcast %11 : vector<1x32xf32> to vector<2x32xf32>
    %13 = arith.addf %10, %12 : vector<2x32xf32>
    %c0_11 = arith.constant 0 : index
    %c0_12 = arith.constant 0 : index
    %14 = vector.load %arg6[%c0_11, %c0_12] : memref<1x32xf32, #tpu.memory_space<vmem>>, vector<1x32xf32>
    %cst_13 = arith.constant 0.000000e+00 : f32
    %15 = vector.broadcast %cst_13 : f32 to vector<1x32xf32>
    %16 = arith.subf %15, %14 : vector<1x32xf32>
    %17 = vector.broadcast %16 : vector<1x32xf32> to vector<2x32xf32>
    %18 = arith.maximumf %17, %13 : vector<2x32xf32>
    %19 = vector.broadcast %14 : vector<1x32xf32> to vector<2x32xf32>
    %20 = arith.minimumf %19, %18 : vector<2x32xf32>
    %21 = vector.extract_strided_slice %20 {offsets = [0, 0], sizes = [2, 8], strides = [1, 1]} : vector<2x32xf32> to vector<2x8xf32>
    %22 = vector.extract_strided_slice %20 {offsets = [0, 8], sizes = [2, 8], strides = [1, 1]} : vector<2x32xf32> to vector<2x8xf32>
    %23 = arith.addf %21, %22 : vector<2x8xf32>
    %24 = vector.extract_strided_slice %20 {offsets = [0, 16], sizes = [2, 8], strides = [1, 1]} : vector<2x32xf32> to vector<2x8xf32>
    %25 = arith.addf %23, %24 : vector<2x8xf32>
    %26 = vector.extract_strided_slice %20 {offsets = [0, 24], sizes = [2, 8], strides = [1, 1]} : vector<2x32xf32> to vector<2x8xf32>
    %27 = arith.addf %25, %26 : vector<2x8xf32>
    %c0_14 = arith.constant 0 : index
    %c0_15 = arith.constant 0 : index
    %28 = vector.load %arg7[%c0_14, %c0_15] : memref<2x8xf32, #tpu.memory_space<vmem>>, vector<2x8xf32>
    tpu.vector_store %arg7[%c0_14, %c0_15], %27 {strides = array<i32>} : memref<2x8xf32, #tpu.memory_space<vmem>>, vector<2x8xf32>,
    return
  }
  func.func @transform_0(%arg0: i32) -> (i32, i32) {
    %c0_i32 = arith.constant 0 : i32
    %c0_i32_0 = arith.constant 0 : i32
    return %arg0, %c0_i32 : i32, i32
  }
  func.func @transform_1(%arg0: i32) -> (i32, i32) {
    %c0_i32 = arith.constant 0 : i32
    %c0_i32_0 = arith.constant 0 : i32
    %c0_i32_1 = arith.constant 0 : i32
    return %c0_i32, %c0_i32_0 : i32, i32
  }
  func.func @transform_2(%arg0: i32) -> (i32, i32) {
    %c0_i32 = arith.constant 0 : i32
    %c0_i32_0 = arith.constant 0 : i32
    %c0_i32_1 = arith.constant 0 : i32
    return %c0_i32, %c0_i32_0 : i32, i32
  }
  func.func @transform_3(%arg0: i32) -> (i32, i32) {
    %c0_i32 = arith.constant 0 : i32
    %c0_i32_0 = arith.constant 0 : i32
    %c0_i32_1 = arith.constant 0 : i32
    return %c0_i32, %c0_i32_0 : i32, i32
  }
  func.func @transform_4(%arg0: i32) -> (i32, i32) {
    %c0_i32 = arith.constant 0 : i32
    %c0_i32_0 = arith.constant 0 : i32
    %c0_i32_1 = arith.constant 0 : i32
    return %c0_i32, %c0_i32_0 : i32, i32
  }
  func.func @transform_5(%arg0: i32) -> (i32, i32) {
    %c0_i32 = arith.constant 0 : i32
    %c0_i32_0 = arith.constant 0 : i32
    %c0_i32_1 = arith.constant 0 : i32
    return %c0_i32, %c0_i32_0 : i32, i32
  }
  func.func @transform_6(%arg0: i32) -> (i32, i32) {
    %c0_i32 = arith.constant 0 : i32
    %c0_i32_0 = arith.constant 0 : i32
    return %arg0, %c0_i32 : i32, i32
  }
}

</mosaic_0001>

<bundles_post_ra>
// kernel: tpu_custom_call.1
= control target key start
LH: loop header
LB: loop body
LE: loop exit
PB: predicated region body
PF: predicated region fallthrough
CT: control target
= control target key end

     0   :  { %11 = vsyncpa [#allocation3], 0  ;;  %s1380_s0 = inlined_call_operand.vmem [shape: bf16[2,1024], index: 0, kind: input, shape index: {}]   ;;  %s1381_s1 = inlined_call_operand.hbm [shape: bf16[1024,128], index: 1, kind: input, shape index: {}]   ;;  %s1382_s2 = inlined_call_operand.vmem [shape: f32[1,128], index: 2, kind: input, shape index: {}]   ;;  %s1383_s3 = inlined_call_operand.vmem [shape: bf16[128,32], index: 3, kind: input, shape index: {}]   ;;  %s1384_s4 = inlined_call_operand.vmem [shape: f32[1,32], index: 4, kind: input, shape index: {}]   ;;  %s1385_s5 = inlined_call_operand.vmem [shape: f32[1,32], index: 5, kind: input, shape index: {}]   ;;  %s1386_s6 = inlined_call_operand.hbm [shape: f32[2,8], index: 6, kind: output, shape index: {}]  }
   0x1   :  { %12 = vsyncpa [#allocation4], 0  ;;  %s1258_s21 = smov [#allocation2]   ;;  %s1210_s25 = scalar_lea.hbm %s1381_s1, 8192 }
   0x2   :  { %s20_s22 = sshll.u32 %s1258_s21, 4  ;;  %p1211_p0 = scmp.ne.s32.totalorder %s1381_s1, %s1210_s25  ;;  %s21_s22 = int_to_ptr.vmem [resolvable:$true] %s20_s22 }
   0x3   :  { %p1214_p1 = scmp.lt.u32.totalorder %s1210_s25, %s1381_s1 }
   0x5   :  { %p1216_p2 = pnand %p1214_p1, %p1211_p0 }
   0x7   :  { %1219 = shalt.err (!%p1216_p2)
}
   0x8   :  { %s1220_s30 = scalar_lea.vmem %s21_s22, 8192  ;;  %p1225_p4 = scmp.lt.s32.totalorder %s21_s22, %s21_s22 }
   0x9   :  { %p1221_p3 = scmp.ne.s32.totalorder %s21_s22, %s1220_s30  ;;  %p1226_p5 = scmp.lt.s32.totalorder %s1220_s30, %s1220_s30 }
   0xb   :  { %p1227_p6 = por %p1226_p5, %p1225_p4 }
   0xd   :  { %p1228_p7 = pnand %p1227_p6, %p1221_p3 }
   0xf   :  { %1231 = shalt.err (!%p1228_p7)
}
  0x10   :  { %s1259_s7 = smov 64   ;;  %s1260_s8 = smov 4  }
  0x11   :  { %26 = dma.hbm_to_vmem [thread:$0]  %s1381_s1, 8192, %s21_s22, [#allocation3], %s1259_s7, %s1259_s7, %s1260_s8  }
  0x12   :  { %1254 = dma.done.wait [#allocation3], 8192  }
  0x13   :  { %1255 = vsyncadd [#allocation3], 4294959104  ;;  %v1137_v0 = vld [vmem:[#allocation2 + $0x40] sm:$0xff]   ;;  %v1141_v4 = vld [vmem:[#allocation2 + $0x48] sm:$0xff]   ;;  %v1261_v22 = vmov 1966171168   ;;  %v180_v24 = vlaneseq }
  0x14   :  { %v1138_v1 = vld [vmem:[#allocation2 + $0xc0] sm:$0xff]   ;;  %1010 = vmatprep.subr.bf16.mxu0 %v1137_v0  ;;  %v1142_v5 = vld [vmem:[#allocation2 + $0xc8] sm:$0xff]   ;;  %v1145_v8 = vld [vmem:[#allocation2 + $0x50] sm:$0xff]   ;;  %v178_v23 = vunpack.c.l.s4 %v1261_v22  ;;  %vm1263_vm0 = vmmov 0   ;;  %s1264_s7 = smov 104   ;;  %s1265_s8 = smov 120  }
  0x15   :  { %v1139_v2 = vld [vmem:[#allocation2] sm:$0xff]   ;;  %1032 = vmatprep.subr.bf16.mxu1 %v1138_v1  ;;  %v1143_v6 = vld [vmem:[#allocation2 + $0x8] sm:$0xff]   ;;  %v1146_v9 = vld [vmem:[#allocation2 + $0xd0] sm:$0xff]   ;;  %v1315_v30 = vshrl.u32 %v180_v24, 7  ;;  %s1267_s9 = smov [#allocation5]   ;;  %vm919_vm1 = vcmask 58368  }
  0x16   :  { %v1140_v3 = vld [vmem:[#allocation2 + $0x80] sm:$0xff]   ;;  %1011 = vmatpush3.bf16.msra.mxu0 %v1139_v2  ;;  %v1144_v7 = vld [vmem:[#allocation2 + $0x88] sm:$0xff]   ;;  %v1147_v10 = vld [vmem:[#allocation2 + $0x10] sm:$0xff]   ;;  %v179_v29 = vunpack.c.0.s8 %v178_v23 }
  0x17   :  { %1033 = vmatpush3.bf16.msra.mxu1 %v1140_v3  ;;  %1012 = vmatprep.subr.bf16.mxu0 %v1141_v4  ;;  %v1148_v11 = vld [vmem:[#allocation2 + $0x90] sm:$0xff]   ;;  %v1149_v12 = vld [vmem:[#allocation2 + $0x58] sm:$0xff]   ;;  %v1153_v16 = vld [vmem:[#allocation2 + $0x60] sm:$0xff]  }
  0x18   :  { %1034 = vmatprep.subr.bf16.mxu1 %v1142_v5  ;;  %v1150_v13 = vld [vmem:[#allocation2 + $0xd8] sm:$0xff]   ;;  %v1154_v17 = vld [vmem:[#allocation2 + $0xe0] sm:$0xff]   ;;  %v1157_v20 = vld [vmem:[#allocation2 + $0x68] sm:$0xff]   ;;  %v1318_v35 = vsub.s32 %v179_v29, %v1315_v30 }
  0x19   :  { %v1151_v14 = vld [vmem:[#allocation2 + $0x18] sm:$0xff]   ;;  %v1155_v18 = vld [vmem:[#allocation2 + $0x20] sm:$0xff]   ;;  %v1158_v21 = vld [vmem:[#allocation2 + $0xe8] sm:$0xff]  }
  0x1a   :  { %1013 = vmatpush3.bf16.msra.mxu0 %v1143_v6  ;;  %v1152_v15 = vld [vmem:[#allocation2 + $0x98] sm:$0xff]   ;;  %v1156_v19 = vld [vmem:[#allocation2 + $0xa0] sm:$0xff]   ;;  %v1159_v25 = vld [vmem:[#allocation2 + $0x28] sm:$0xff]  }
  0x1b   :  { %1035 = vmatpush3.bf16.msra.mxu1 %v1144_v7  ;;  %1014 = vmatprep.subr.bf16.mxu0 %v1145_v8  ;;  %v1160_v26 = vld [vmem:[#allocation2 + $0xa8] sm:$0xff]   ;;  %v1161_v27 = vld [vmem:[#allocation2 + $0x70] sm:$0xff]   ;;  %v1165_v33 = vld [vmem:[#allocation2 + $0x78] sm:$0xff]  }
  0x1c   :  { %1036 = vmatprep.subr.bf16.mxu1 %v1146_v9  ;;  %v1162_v28 = vld [vmem:[#allocation2 + $0xf0] sm:$0xff]   ;;  %v1166_v34 = vld [vmem:[#allocation2 + $0xf8] sm:$0xff]   ;;  %v39_v38 = vld [vmem:[%s1380_s0] sm:$0xff] }
  0x1d   :  { %v1163_v31 = vld [vmem:[#allocation2 + $0x30] sm:$0xff]   ;;  %v1167_v36 = vld [vmem:[#allocation2 + $0x38] sm:$0xff]   ;;  %v176_v39 = vcombine.high %v39_v38, %v39_v38  ;;  %v183_v40 = vrot.slane %v39_v38, %v1318_v35  ;;  %v1170_v41 = vld [vmem:[#allocation2 + $0x140] sm:$0xff]  }
  0x1e   :  { %1015 = vmatpush3.bf16.msra.mxu0 %v1147_v10  ;;  %v1164_v32 = vld [vmem:[#allocation2 + $0xb0] sm:$0xff]   ;;  %v1168_v37 = vld [vmem:[#allocation2 + $0xb8] sm:$0xff]   ;;  %v1171_v42 = vld [vmem:[#allocation2 + $0x1c0] sm:$0xff]  }
  0x1f   :  { %1037 = vmatpush3.bf16.msra.mxu1 %v1148_v11  ;;  %1016 = vmatprep.subr.bf16.mxu0 %v1149_v12  ;;  %v191_v43 = vcombine.high %v183_v40, %v183_v40  ;;  %v199_v44 = vrot.slane %v183_v40, %v1318_v35  ;;  %v1326_v45 = vrot.slane %v176_v39, %v1318_v35  ;;  %v1172_v46 = vld [vmem:[#allocation2 + $0x100] sm:$0xff]   ;;  %v1174_v51 = vld [vmem:[#allocation2 + $0x148] sm:$0xff]   ;;  %v1178_v58 = vld [vmem:[#allocation2 + $0x150] sm:$0xff]  }
  0x20   :  { %1038 = vmatprep.subr.bf16.mxu1 %v1150_v13  ;;  %v1173_v48 = vld [vmem:[#allocation2 + $0x180] sm:$0xff]   ;;  %v1175_v53 = vld [vmem:[#allocation2 + $0x1c8] sm:$0xff]   ;;  %v1179_v59 = vld [vmem:[#allocation2 + $0x1d0] sm:$0xff]  }
  0x21   :  { %v213_v47 = vrot.slane %v191_v43, %v1318_v35  ;;  %v192_v49 = vcombine.high %v1326_v45, %v1326_v45  ;;  %v221_v50 = vcombine.high %v199_v44, %v199_v44  ;;  %v1176_v55 = vld [vmem:[#allocation2 + $0x108] sm:$0xff]   ;;  %v1180_v60 = vld [vmem:[#allocation2 + $0x110] sm:$0xff]   ;;  %v1182_v62 = vld [vmem:[#allocation2 + $0x158] sm:$0xff]  }
  0x22   :  { %1017 = vmatpush3.bf16.msra.mxu0 %v1151_v14  ;;  %v1177_v56 = vld [vmem:[#allocation2 + $0x188] sm:$0xff]   ;;  %v1181_v61 = vld [vmem:[#allocation2 + $0x190] sm:$0xff]   ;;  %v1183_v63 = vld [vmem:[#allocation2 + $0x1d8] sm:$0xff]  }
  0x23   :  { %1039 = vmatpush3.bf16.msra.mxu1 %v1152_v15  ;;  %1018 = vmatprep.subr.bf16.mxu0 %v1153_v16  ;;  %v223_v52 = vcombine.high %v213_v47, %v213_v47  ;;  %v220_v54 = vrot.slane %v192_v49, %v1318_v35  ;;  %v1184_v0 = vld [vmem:[#allocation2 + $0x118] sm:$0xff]   ;;  %v1186_v2 = vld [vmem:[#allocation2 + $0x160] sm:$0xff]   ;;  %v1190_v6 = vld [vmem:[#allocation2 + $0x168] sm:$0xff]  }
  0x24   :  { %1040 = vmatprep.subr.bf16.mxu1 %v1154_v17  ;;  %649 = vmatprep.mubr.bf16.mxu0 %v213_v47  ;;  %v1185_v1 = vld [vmem:[#allocation2 + $0x198] sm:$0xff]   ;;  %v1187_v3 = vld [vmem:[#allocation2 + $0x1e0] sm:$0xff]   ;;  %v1191_v7 = vld [vmem:[#allocation2 + $0x1e8] sm:$0xff]  }
  0x25   :  { %689 = vmatprep.mubr.bf16.mxu1 %v223_v52  ;;  %v224_v57 = vcombine.high %v220_v54, %v220_v54  ;;  %v1188_v4 = vld [vmem:[#allocation2 + $0x120] sm:$0xff]   ;;  %v1192_v8 = vld [vmem:[#allocation2 + $0x128] sm:$0xff]   ;;  %v1194_v10 = vld [vmem:[#allocation2 + $0x170] sm:$0xff]  }
  0x26   :  { %1019 = vmatpush3.bf16.msra.mxu0 %v1155_v18  ;;  %v1189_v5 = vld [vmem:[#allocation2 + $0x1a0] sm:$0xff]   ;;  %v1193_v9 = vld [vmem:[#allocation2 + $0x1a8] sm:$0xff]   ;;  %v1195_v11 = vld [vmem:[#allocation2 + $0x1f0] sm:$0xff]   ;;  %v206_v18 = vrot.slane %v1326_v45, %v1318_v35 }
  0x27   :  { %1041 = vmatpush3.bf16.msra.mxu1 %v1156_v19  ;;  %1020 = vmatprep.subr.bf16.mxu0 %v1157_v20  ;;  %v1196_v12 = vld [vmem:[#allocation2 + $0x130] sm:$0xff]   ;;  %v1198_v14 = vld [vmem:[#allocation2 + $0x178] sm:$0xff]   ;;  %v1202_v20 = vld [vmem:[%s1383_s3] sm:$0xff]  }
  0x28   :  { %1042 = vmatprep.subr.bf16.mxu1 %v1158_v21  ;;  %v1197_v13 = vld [vmem:[#allocation2 + $0x1b0] sm:$0xff]   ;;  %v1199_v15 = vld [vmem:[#allocation2 + $0x1f8] sm:$0xff]   ;;  %v222_v19 = vcombine.high %v206_v18, %v206_v18  ;;  %v1262_v21 = vmov 0.0   ;;  %v1203_v22 = vld [vmem:[%s1383_s3 + $0x8] sm:$0xff]  }
  0x29   :  { %v1200_v16 = vld [vmem:[#allocation2 + $0x138] sm:$0xff]   ;;  %v1204_v23 = vld [vmem:[%s1383_s3 + $0x10] sm:$0xff]  }
  0x2a   :  { %1021 = vmatpush3.bf16.msra.mxu0 %v1159_v25  ;;  %v1201_v17 = vld [vmem:[#allocation2 + $0x1b8] sm:$0xff]   ;;  %v1206_v25 = vld [vmem:[%s1383_s3 + $0x20] sm:$0xff]  }
  0x2b   :  { %1043 = vmatpush3.bf16.msra.mxu1 %v1160_v26  ;;  %1022 = vmatprep.subr.bf16.mxu0 %v1161_v27  ;;  %v1205_v24 = vld [vmem:[%s1383_s3 + $0x18] sm:$0xff]   ;;  %v1207_v26 = vld [vmem:[%s1383_s3 + $0x28] sm:$0xff]   ;;  %v1208_v27 = vld [vmem:[%s1383_s3 + $0x30] sm:$0xff]  }
  0x2c   :  { %1044 = vmatprep.subr.bf16.mxu1 %v1162_v28  ;;  %v1209_v28 = vld [vmem:[%s1383_s3 + $0x38] sm:$0xff]  }
  0x2e   :  { %1023 = vmatpush3.bf16.msra.mxu0 %v1163_v31  ;;  %v936_v31 = vld [vmem:[%s1382_s2] ss:$0 sm:$0xff] }
  0x2f   :  { %1045 = vmatpush3.bf16.msra.mxu1 %v1164_v32  ;;  %1024 = vmatprep.subr.bf16.mxu0 %v1165_v33 }
  0x30   :  { %1046 = vmatprep.subr.bf16.mxu1 %v1166_v34 }
  0x32   :  { %1025 = vmatpush3.bf16.msra.mxu0 %v1167_v36 }
  0x33   :  { %1047 = vmatpush3.bf16.msra.mxu1 %v1168_v37  ;;  %1054 = vmatprep.subr.bf16.mxu0 %v1170_v41 }
  0x34   :  { %1076 = vmatprep.subr.bf16.mxu1 %v1171_v42 }
  0x35   :  { %650 = vmatmul.mubr.bf16.vlgmr.msra.gmra.mrb[0].mxu0 %v199_v44 }
  0x36   :  { %1055 = vmatpush3.bf16.msra.mxu0 %v1172_v46  ;;  %690 = vmatmul.mubr.bf16.vlgmr.msra.gmra.mrb[0].mxu1 %v221_v50 }
  0x37   :  { %1056 = vmatprep.subr.bf16.mxu0 %v1174_v51  ;;  %1077 = vmatpush3.bf16.msra.mxu1 %v1173_v48 }
  0x38   :  { %729 = vmatprep.mubr.bf16.mxu0 %v220_v54  ;;  %1078 = vmatprep.subr.bf16.mxu1 %v1175_v53 }
  0x39   :  { %769 = vmatprep.mubr.bf16.mxu1 %v224_v57  ;;  %v890_v57 = vld [vmem:[%s1385_s5] sm:$0x1]  ;;  %s1266_s5 = smov 112  }
  0x3a   :  { %1057 = vmatpush3.bf16.msra.mxu0 %v1176_v55 }
  0x3b   :  { %1058 = vmatprep.subr.bf16.mxu0 %v1178_v58  ;;  %1079 = vmatpush3.bf16.msra.mxu1 %v1177_v56  ;;  %v891_v58 = vsub.f32 0.0, %v890_v57 }
  0x3c   :  { %1080 = vmatprep.subr.bf16.mxu1 %v1179_v59  ;;  %v895_v59 = vsub.s32 0, %v1315_v30 }
  0x3e   :  { %1059 = vmatpush3.bf16.msra.mxu0 %v1180_v60  ;;  %v1001_v60 = vld [vmem:[%s1384_s4] ss:$0 sm:$0xff]  ;;  %s927_s4 = sshll.u32 %s1267_s9, 4  ;;  %s928_s4 = int_to_ptr.vmem [resolvable:$true] %s927_s4 }
  0x3f   :  { %1060 = vmatprep.subr.bf16.mxu0 %v1182_v62  ;;  %1081 = vmatpush3.bf16.msra.mxu1 %v1181_v61  ;;  %v896_v61 = vrot.slane %v891_v58, %v895_v59  ;;  %s1232_s10 = scalar_lea.vmem %s928_s4, 32  ;;  %p1237_p9 = scmp.lt.s32.totalorder %s928_s4, %s928_s4 }
  0x40   :  { %1082 = vmatprep.subr.bf16.mxu1 %v1183_v63  ;;  %p1233_p8 = scmp.ne.s32.totalorder %s928_s4, %s1232_s10  ;;  %p1238_p10 = scmp.lt.s32.totalorder %s1232_s10, %s1232_s10 }
  0x42   :  { %1061 = vmatpush3.bf16.msra.mxu0 %v1184_v0  ;;  %v903_v0 = vrot.slane %v890_v57, %v895_v59  ;;  %p1239_p11 = por %p1238_p10, %p1237_p9 }
  0x43   :  { %1062 = vmatprep.subr.bf16.mxu0 %v1186_v2  ;;  %1083 = vmatpush3.bf16.msra.mxu1 %v1185_v1 }
  0x44   :  { %1084 = vmatprep.subr.bf16.mxu1 %v1187_v3  ;;  %p1240_p12 = pnand %p1239_p11, %p1233_p8 }
  0x46   :  { %1063 = vmatpush3.bf16.msra.mxu0 %v1188_v4 }
  0x47   :  { %1064 = vmatprep.subr.bf16.mxu0 %v1190_v6  ;;  %1085 = vmatpush3.bf16.msra.mxu1 %v1189_v5 }
  0x48   :  { %1086 = vmatprep.subr.bf16.mxu1 %v1191_v7 }
  0x4a   :  { %1065 = vmatpush3.bf16.msra.mxu0 %v1192_v8 }
  0x4b   :  { %1066 = vmatprep.subr.bf16.mxu0 %v1194_v10  ;;  %1087 = vmatpush3.bf16.msra.mxu1 %v1193_v9 }
  0x4c   :  { %1088 = vmatprep.subr.bf16.mxu1 %v1195_v11 }
  0x4e   :  { %1067 = vmatpush3.bf16.msra.mxu0 %v1196_v12 }
  0x4f   :  { %1068 = vmatprep.subr.bf16.mxu0 %v1198_v14  ;;  %1089 = vmatpush3.bf16.msra.mxu1 %v1197_v13 }
  0x50   :  { %1090 = vmatprep.subr.bf16.mxu1 %v1199_v15 }
  0x52   :  { %1069 = vmatpush3.bf16.msra.mxu0 %v1200_v16 }
  0x53   :  { %1091 = vmatpush3.bf16.msra.mxu1 %v1201_v17  ;;  %1107 = vmatprep.subr.bf16.mxu0 %v1262_v21 }
  0x55   :  { %730 = vmatmul.mubr.bf16.vlgmr.msra.gmra.mrb[4].mxu0 %v206_v18 }
  0x56   :  { %770 = vmatmul.mubr.bf16.vlgmr.msra.gmra.mrb[4].mxu1 %v222_v19  ;;  %1108 = vmatpush3.bf16.msra.mxu0 %v1202_v20 }
  0x57   :  { %1109 = vmatprep.subr.bf16.mxu0 %v1262_v21  ;;  %1123 = vmatprep.mubr.msk.bf16.mxu0 %vm1263_vm0, %v1262_v21 }
  0x5a   :  { %1110 = vmatpush3.bf16.msra.mxu0 %v1203_v22 }
  0x5b   :  { %1111 = vmatprep.subr.bf16.mxu0 %v1262_v21 }
  0x5e   :  { %1112 = vmatpush3.bf16.msra.mxu0 %v1204_v23 }
  0x5f   :  { %1113 = vmatprep.subr.bf16.mxu0 %v1262_v21 }
  0x62   :  { %1114 = vmatpush3.bf16.msra.mxu0 %v1205_v24 }
  0x63   :  { %1115 = vmatprep.subr.bf16.mxu0 %v1262_v21 }
  0x66   :  { %1116 = vmatpush3.bf16.msra.mxu0 %v1206_v25 }
  0x67   :  { %1117 = vmatprep.subr.bf16.mxu0 %v1262_v21 }
  0x6a   :  { %1118 = vmatpush3.bf16.msra.mxu0 %v1207_v26 }
  0x6b   :  { %1119 = vmatprep.subr.bf16.mxu0 %v1262_v21 }
  0x6e   :  { %1120 = vmatpush3.bf16.msra.mxu0 %v1208_v27 }
  0x6f   :  { %1121 = vmatprep.subr.bf16.mxu0 %v1262_v21 }
  0x72   :  { %1122 = vmatpush3.bf16.msra.mxu0 %v1209_v28 }
 0x108   :  { %v1026_v29 = vpop.f32.mrb[0].mxu0 }
 0x109   :  { %v1027_v32 = vpop.f32.mrb[1].mxu0  ;;  %v1048_v33 = vpop.f32.mrb[0].mxu1 }
 0x10a   :  { %v1028_v34 = vadd.f32 %v1027_v32, %v1026_v29  ;;  %v1029_v35 = vpop.f32.mrb[2].mxu0  ;;  %v1049_v36 = vpop.f32.mrb[1].mxu1 }
 0x10b   :  { %v1030_v37 = vpop.f32.mrb[3].mxu0  ;;  %v1050_v39 = vadd.f32 %v1049_v36, %v1048_v33  ;;  %v1051_v40 = vpop.f32.mrb[2].mxu1 }
 0x10c   :  { %v652_v38 = vadd.f32 %v1028_v34, %v936_v31  ;;  %v1052_v41 = vpop.f32.mrb[3].mxu1 }
 0x10e   :  { %v692_v42 = vadd.f32 %v1050_v39, %v652_v38 }
 0x128   :  { %v1070_v43 = vpop.f32.mrb[4].mxu0 }
 0x129   :  { %v1071_v44 = vpop.f32.mrb[5].mxu0  ;;  %v1092_v45 = vpop.f32.mrb[4].mxu1 }
 0x12a   :  { %v1072_v46 = vadd.f32 %v1071_v44, %v1070_v43  ;;  %v1073_v47 = vpop.f32.mrb[6].mxu0  ;;  %v1093_v48 = vpop.f32.mrb[5].mxu1 }
 0x12b   :  { %v1074_v49 = vpop.f32.mrb[7].mxu0  ;;  %v1094_v51 = vadd.f32 %v1093_v48, %v1092_v45  ;;  %v1095_v52 = vpop.f32.mrb[6].mxu1 }
 0x12c   :  { %v732_v50 = vadd.f32 %v1072_v46, %v692_v42  ;;  %v1096_v53 = vpop.f32.mrb[7].mxu1 }
 0x12e   :  { %v772_v54 = vadd.f32 %v1094_v51, %v732_v50 }
 0x130   :  { %v777_v55 = vmax.f32 %v772_v54, 0.0 }
 0x132   :  { %v778_v56 = vpack.c.bf16 %v777_v55, %v777_v55 }
 0x134   :  { %1124 = vmatmul.mubr.bf16.vlgmr.msra.gmra.mrb[8].mxu0 %v778_v56 }
 0x207   :  { %v884_v62 = vpop.f32.mrb[8].mxu0 }
 0x208   :  { %v885_v63 = vadd.f32 %v1001_v60, %v884_v62  ;;  %v1125_v1 = vpop.f32.mrb[9].mxu0 }
 0x209   :  { %v887_v2 = vpop.f32.mrb[10].mxu0 }
 0x20a   :  { %v898_v3 = vmax.f32 %v896_v61, %v885_v63  ;;  %v1126_v4 = vpop.f32.mrb[11].mxu0 }
 0x20c   :  { %v905_v5 = vmin.f32 %v903_v0, %v898_v3 }
 0x20e   :  { %915 = vrot.lane.b32.xlu1 %v905_v5, %s1264_s7  ;;  %907 = vrot.lane.b32.xlu0 %v905_v5, %s1265_s8 }
 0x212   :  { %911 = vrot.lane.b32.xlu0 %v905_v5, %s1266_s5 }
 0x280   :  { %v908_v30 = vpop.permute.xlu0 %907  ;;  %v916_v9 = vpop.permute.xlu1 %915 }
 0x281   :  { %v910_v6 = vadd.f32 %v908_v30, %v905_v5 }
 0x284   :  { %v912_v7 = vpop.permute.xlu0 %911 }
 0x285   :  { %v914_v8 = vadd.f32 %v912_v7, %v910_v6 }
 0x287   :  { %v918_v10 = vadd.f32 %v916_v9, %v914_v8 }
 0x289   :  { %920 = vst.msk [vmem:[#allocation5] sm:$0x3] %vm919_vm1, %v918_v10 }
 0x28a   :  { %1243 = shalt.err (!%p1240_p12)
}
 0x28b   :  { %s1244_s0 = scalar_lea.hbm %s1386_s6, 32 }
 0x28c   :  { %p1245_p13 = scmp.ne.s32.totalorder %s1386_s6, %s1244_s0  ;;  %p1248_p0 = scmp.lt.u32.totalorder %s1244_s0, %s1386_s6 }
 0x28e   :  { %p1250_p1 = pnand %p1248_p0, %p1245_p13 }
 0x290   :  { %1253 = shalt.err (!%p1250_p1)
}
 0x291   :  { %930 = dma.vmem_to_hbm [thread:$0]  %s928_s4, 32, %s1386_s6, [#allocation4]  }
 0x292   :  { %1256 = dma.done.wait [#allocation4], 32  }
 0x293   :  { %1257 = vsyncadd [#allocation4], 4294967264 }
 0x294   :  { %934 = vsyncpa [#allocation3], 1 }
 0x295   :  { %935 = vsyncpa [#allocation4], 1 }

</bundles_post_ra>
